<compile_context>
chip_gen: v6e
topology: v6e:2x2x1
jax: 0.10.0
libtpu: 0.0.40
codegen_flags: <defaults>
</compile_context>

<pallas_src>
import jax
import jax.numpy as jnp
from jax.experimental import pallas as pl
from jax.experimental.pallas import tpu as pltpu


def _linear_l2norm_kernel(x_ref, w_ref, b_ref, o_ref):
    # y = x @ W + b   (MXU matmul, f32 accumulation)
    y = jnp.dot(x_ref[...], w_ref[...], preferred_element_type=jnp.float32)
    y = y + b_ref[...]                       # (tb, C) + (1, C) broadcast
    # Row-wise L2 normalization, matching torch.nn.functional.normalize
    # (eps = 1e-12 on the norm  <=>  1e-24 on the squared sum).
    ssum = jnp.sum(y * y, axis=-1, keepdims=True)
    inv = jax.lax.rsqrt(jnp.maximum(ssum, 1e-24))   # EUP rsqrt, ~free slot
    o_ref[...] = (y * inv).astype(o_ref.dtype)


def linear_l2norm(x, w, b, *, block_rows=128):
    """Fused  F.normalize(x @ w + b, p=2, dim=1)  as one Pallas kernel.

    x: (B, D) activations, w: (D, C) weights, b: (C,) bias.
    """
    B, D = x.shape
    Dw, C = w.shape
    assert D == Dw, (D, Dw)
    b2 = jnp.reshape(b, (1, C))

    # Row tile: full batch if small (block == full array dim is always legal),
    # otherwise 128-row tiles (multiple of 8 sublanes) with a masked partial
    # last block via pl.cdiv.  L2 norm is per-row, so row tiling is exact.
    tb = B if B <= block_rows else block_rows
    grid = (pl.cdiv(B, tb),)

    itemsize = jnp.dtype(x.dtype).itemsize
    cost = pl.CostEstimate(
        flops=2 * B * D * C + 3 * B * C,
        transcendentals=B,
        bytes_accessed=(B * D + D * C + C + B * C) * itemsize,
    )

    return pl.pallas_call(
        _linear_l2norm_kernel,
        out_shape=jax.ShapeDtypeStruct((B, C), x.dtype),
        grid=grid,
        in_specs=[
            pl.BlockSpec((tb, D), lambda i: (i, 0)),   # activations: row tiles
            pl.BlockSpec((D, C), lambda i: (0, 0)),    # weights: resident
            pl.BlockSpec((1, C), lambda i: (0, 0)),    # bias: resident
        ],
        out_specs=pl.BlockSpec((tb, C), lambda i: (i, 0)),
        compiler_params=pltpu.CompilerParams(
            dimension_semantics=("parallel",),  # v7x: split row tiles over 2 TCs
        ),
        cost_estimate=cost,
    )(x, w, b2)


def _squeeze_features(feat):
    """VideoBaseNetwork: base(x).squeeze() followed by GDT's unsqueeze(0) fixup.

    Pooled backbone output is (B, 512, 1, 1, 1); the net effect for any B
    (including B == 1) is a (B, 512) view.  This is metadata-only, so per the
    performance review it is a plain reshape — no Pallas data path.
    """
    b = feat.shape[0]
    return jnp.reshape(feat, (b, -1))


def gdt_forward(vid_feats, spec_feats, params):
    """GDT head forward (use_mlp=False, norm_feat=True).

    vid_feats / spec_feats: pooled backbone outputs, shape (B, 512, 1, 1, 1).
    TODO(synk): the r2plus1d_18 backbones producing these features are not
    translated to Pallas; they are taken as inputs here.
    """
    v = _squeeze_features(vid_feats)
    a = _squeeze_features(spec_feats)
    nce_v = linear_l2norm(v, params["w_v"], params["b_v"])
    nce_a = linear_l2norm(a, params["w_a"], params["b_a"])
    return nce_v, nce_a


def _ref_head(x, w, b):
    y = x @ w + b
    n = jnp.maximum(jnp.sqrt(jnp.sum(y * y, axis=1, keepdims=True)), 1e-12)
    return y / n


if __name__ == "__main__":
    key = jax.random.PRNGKey(0)
    k1, k2, k3, k4, k5, k6 = jax.random.split(key, 6)

    B = 2                # batch
    ENCODER_DIM = 512    # r2plus1d_18 feature dim
    NUM_CLASSES = 256    # GDT default num_classes

    # Simulated pooled backbone outputs: (B, 512, 1, 1, 1), as produced by
    # AdaptiveAvgPool3d((1,1,1)) on the r2plus1d_18 trunk.
    vid_feats = jax.random.normal(k1, (B, ENCODER_DIM, 1, 1, 1), dtype=jnp.float32)
    spec_feats = jax.random.normal(k2, (B, ENCODER_DIM, 1, 1, 1), dtype=jnp.float32)

    params = {
        "w_v": jax.random.normal(k3, (ENCODER_DIM, NUM_CLASSES), jnp.float32) * 0.02,
        "b_v": jax.random.normal(k4, (NUM_CLASSES,), jnp.float32) * 0.02,
        "w_a": jax.random.normal(k5, (ENCODER_DIM, NUM_CLASSES), jnp.float32) * 0.02,
        "b_a": jax.random.normal(k6, (NUM_CLASSES,), jnp.float32) * 0.02,
    }

    fwd = jax.jit(gdt_forward)
    nce_v, nce_a = jax.block_until_ready(fwd(vid_feats, spec_feats, params))

    # Pure-JAX reference of the GDT head.
    v2d = jnp.reshape(vid_feats, (B, -1))
    a2d = jnp.reshape(spec_feats, (B, -1))
    ref_v = _ref_head(v2d, params["w_v"], params["b_v"])
    ref_a = _ref_head(a2d, params["w_a"], params["b_a"])

    assert nce_v.shape == (B, NUM_CLASSES), nce_v.shape
    assert nce_a.shape == (B, NUM_CLASSES), nce_a.shape
    assert bool(jnp.allclose(nce_v, ref_v, atol=1e-5, rtol=1e-5))
    assert bool(jnp.allclose(nce_a, ref_a, atol=1e-5, rtol=1e-5))
    # Outputs are unit-norm rows.
    assert bool(jnp.allclose(jnp.linalg.norm(nce_v, axis=1), 1.0, atol=1e-4))
    assert bool(jnp.allclose(jnp.linalg.norm(nce_a, axis=1), 1.0, atol=1e-4))

    print("KERNEL_OK")
</pallas_src>

<mosaic_0001>
module attributes {stable_mosaic.version = 11 : i64} {
  func.func @_linear_l2norm_kernel(%arg0: i32, %arg1: memref<2x512xf32, #tpu.memory_space<vmem>>, %arg2: memref<512x256xf32, #tpu.memory_space<vmem>>, %arg3: memref<1x256xf32, #tpu.memory_space<vmem>>, %arg4: memref<2x256xf32, #tpu.memory_space<vmem>>) attributes {dimension_semantics = [#tpu.dimension_semantics<parallel>], iteration_bounds = array<i64: 1>, scalar_prefetch = 0 : i64, scratch_operands = 0 : i64, tpu.core_type = #tpu.core_type<tc>, window_params = [{transform_indices = @transform_0, window_bounds = array<i64: 2, 512>}, {pipeline_mode = #tpu.pipeline_mode<synchronous>, transform_indices = @transform_1, window_bounds = array<i64: 512, 256>}, {pipeline_mode = #tpu.pipeline_mode<synchronous>, transform_indices = @transform_2, window_bounds = array<i64: 1, 256>}, {transform_indices = @transform_3, window_bounds = array<i64: 2, 256>}]} {
    %c0 = arith.constant 0 : index
    %c0_0 = arith.constant 0 : index
    %0 = vector.load %arg1[%c0, %c0_0] : memref<2x512xf32, #tpu.memory_space<vmem>>, vector<2x512xf32>
    %c0_1 = arith.constant 0 : index
    %c0_2 = arith.constant 0 : index
    %1 = vector.load %arg2[%c0_1, %c0_2] : memref<512x256xf32, #tpu.memory_space<vmem>>, vector<512x256xf32>
    %cst = arith.constant dense<0.000000e+00> : vector<2x256xf32>
    %2 = tpu.matmul %0, %1, %cst {dimension_numbers = #tpu.dot_dimension_numbers<[1], [0], [0], [1], [0, 0, 1, 1], [], []>} : vector<2x512xf32>, vector<512x256xf32>, vector<2x256xf32> -> vector<2x256xf32>
    %c0_3 = arith.constant 0 : index
    %c0_4 = arith.constant 0 : index
    %3 = vector.load %arg3[%c0_3, %c0_4] : memref<1x256xf32, #tpu.memory_space<vmem>>, vector<1x256xf32>
    %4 = vector.broadcast %3 : vector<1x256xf32> to vector<2x256xf32>
    %5 = arith.addf %2, %4 : vector<2x256xf32>
    %6 = arith.mulf %5, %5 : vector<2x256xf32>
    %cst_5 = arith.constant dense<0.000000e+00> : vector<2xf32>
    %7 = vector.multi_reduction <add>, %6, %cst_5 [1] : vector<2x256xf32> to vector<2xf32>
    %8 = vector.shape_cast %7 : vector<2xf32> to vector<2x1xf32>
    %cst_6 = arith.constant 1.000000e-24 : f32
    %9 = vector.broadcast %cst_6 : f32 to vector<2x1xf32>
    %10 = arith.maximumf %8, %9 : vector<2x1xf32>
    %11 = math.rsqrt %10 : vector<2x1xf32>
    %12 = vector.broadcast %11 : vector<2x1xf32> to vector<2x256xf32>
    %13 = arith.mulf %5, %12 : vector<2x256xf32>
    %c0_7 = arith.constant 0 : index
    %c0_8 = arith.constant 0 : index
    %14 = vector.load %arg4[%c0_7, %c0_8] : memref<2x256xf32, #tpu.memory_space<vmem>>, vector<2x256xf32>
    tpu.vector_store %arg4[%c0_7, %c0_8], %13 {strides = array<i32>} : memref<2x256xf32, #tpu.memory_space<vmem>>, vector<2x256xf32>,
    return
  }
  func.func @transform_0(%arg0: i32) -> (i32, i32) {
    %c0_i32 = arith.constant 0 : i32
    %c0_i32_0 = arith.constant 0 : i32
    return %arg0, %c0_i32 : i32, i32
  }
  func.func @transform_1(%arg0: i32) -> (i32, i32) {
    %c0_i32 = arith.constant 0 : i32
    %c0_i32_0 = arith.constant 0 : i32
    %c0_i32_1 = arith.constant 0 : i32
    return %c0_i32, %c0_i32_0 : i32, i32
  }
  func.func @transform_2(%arg0: i32) -> (i32, i32) {
    %c0_i32 = arith.constant 0 : i32
    %c0_i32_0 = arith.constant 0 : i32
    %c0_i32_1 = arith.constant 0 : i32
    return %c0_i32, %c0_i32_0 : i32, i32
  }
  func.func @transform_3(%arg0: i32) -> (i32, i32) {
    %c0_i32 = arith.constant 0 : i32
    %c0_i32_0 = arith.constant 0 : i32
    return %arg0, %c0_i32 : i32, i32
  }
}

module attributes {stable_mosaic.version = 11 : i64} {
  func.func @_linear_l2norm_kernel(%arg0: i32, %arg1: memref<2x512xf32, #tpu.memory_space<vmem>>, %arg2: memref<512x256xf32, #tpu.memory_space<vmem>>, %arg3: memref<1x256xf32, #tpu.memory_space<vmem>>, %arg4: memref<2x256xf32, #tpu.memory_space<vmem>>) attributes {dimension_semantics = [#tpu.dimension_semantics<parallel>], iteration_bounds = array<i64: 1>, scalar_prefetch = 0 : i64, scratch_operands = 0 : i64, tpu.core_type = #tpu.core_type<tc>, window_params = [{transform_indices = @transform_0, window_bounds = array<i64: 2, 512>}, {pipeline_mode = #tpu.pipeline_mode<synchronous>, transform_indices = @transform_1, window_bounds = array<i64: 512, 256>}, {pipeline_mode = #tpu.pipeline_mode<synchronous>, transform_indices = @transform_2, window_bounds = array<i64: 1, 256>}, {transform_indices = @transform_3, window_bounds = array<i64: 2, 256>}]} {
    %c0 = arith.constant 0 : index
    %c0_0 = arith.constant 0 : index
    %0 = vector.load %arg1[%c0, %c0_0] : memref<2x512xf32, #tpu.memory_space<vmem>>, vector<2x512xf32>
    %c0_1 = arith.constant 0 : index
    %c0_2 = arith.constant 0 : index
    %1 = vector.load %arg2[%c0_1, %c0_2] : memref<512x256xf32, #tpu.memory_space<vmem>>, vector<512x256xf32>
    %cst = arith.constant dense<0.000000e+00> : vector<2x256xf32>
    %2 = tpu.matmul %0, %1, %cst {dimension_numbers = #tpu.dot_dimension_numbers<[1], [0], [0], [1], [0, 0, 1, 1], [], []>} : vector<2x512xf32>, vector<512x256xf32>, vector<2x256xf32> -> vector<2x256xf32>
    %c0_3 = arith.constant 0 : index
    %c0_4 = arith.constant 0 : index
    %3 = vector.load %arg3[%c0_3, %c0_4] : memref<1x256xf32, #tpu.memory_space<vmem>>, vector<1x256xf32>
    %4 = vector.broadcast %3 : vector<1x256xf32> to vector<2x256xf32>
    %5 = arith.addf %2, %4 : vector<2x256xf32>
    %6 = arith.mulf %5, %5 : vector<2x256xf32>
    %cst_5 = arith.constant dense<0.000000e+00> : vector<2xf32>
    %7 = vector.multi_reduction <add>, %6, %cst_5 [1] : vector<2x256xf32> to vector<2xf32>
    %8 = vector.shape_cast %7 : vector<2xf32> to vector<2x1xf32>
    %cst_6 = arith.constant 1.000000e-24 : f32
    %9 = vector.broadcast %cst_6 : f32 to vector<2x1xf32>
    %10 = arith.maximumf %8, %9 : vector<2x1xf32>
    %11 = math.rsqrt %10 : vector<2x1xf32>
    %12 = vector.broadcast %11 : vector<2x1xf32> to vector<2x256xf32>
    %13 = arith.mulf %5, %12 : vector<2x256xf32>
    %c0_7 = arith.constant 0 : index
    %c0_8 = arith.constant 0 : index
    %14 = vector.load %arg4[%c0_7, %c0_8] : memref<2x256xf32, #tpu.memory_space<vmem>>, vector<2x256xf32>
    tpu.vector_store %arg4[%c0_7, %c0_8], %13 {strides = array<i32>} : memref<2x256xf32, #tpu.memory_space<vmem>>, vector<2x256xf32>,
    return
  }
  func.func @transform_0(%arg0: i32) -> (i32, i32) {
    %c0_i32 = arith.constant 0 : i32
    %c0_i32_0 = arith.constant 0 : i32
    return %arg0, %c0_i32 : i32, i32
  }
  func.func @transform_1(%arg0: i32) -> (i32, i32) {
    %c0_i32 = arith.constant 0 : i32
    %c0_i32_0 = arith.constant 0 : i32
    %c0_i32_1 = arith.constant 0 : i32
    return %c0_i32, %c0_i32_0 : i32, i32
  }
  func.func @transform_2(%arg0: i32) -> (i32, i32) {
    %c0_i32 = arith.constant 0 : i32
    %c0_i32_0 = arith.constant 0 : i32
    %c0_i32_1 = arith.constant 0 : i32
    return %c0_i32, %c0_i32_0 : i32, i32
  }
  func.func @transform_3(%arg0: i32) -> (i32, i32) {
    %c0_i32 = arith.constant 0 : i32
    %c0_i32_0 = arith.constant 0 : i32
    return %arg0, %c0_i32 : i32, i32
  }
}

</mosaic_0001>

<bundles_post_ra>
// kernel: gdt_forward.2
= control target key start
LH: loop header
LB: loop body
LE: loop exit
PB: predicated region body
PF: predicated region fallthrough
CT: control target
= control target key end

     0   :  { %8 = vsyncpa [#allocation3], 0  ;;  %s505_s0 = inlined_call_operand.vmem [shape: f32[2,512], index: 0, kind: input, shape index: {}]   ;;  %s506_s1 = inlined_call_operand.hbm [shape: f32[512,256], index: 1, kind: input, shape index: {}]   ;;  %s507_s2 = inlined_call_operand.hbm [shape: f32[1,256], index: 2, kind: input, shape index: {}]   ;;  %s508_s3 = inlined_call_operand.hbm [shape: f32[2,256], index: 3, kind: output, shape index: {}]  }
   0x1   :  { %9 = vsyncpa [#allocation6], 0 }
   0x2   :  { %10 = vsyncpa [#allocation4], 0  ;;  %s462_s12 = smov [#allocation2]  }
   0x3   :  { %s18_s13 = sshll.u32 %s462_s12, 4  ;;  %s19_s13 = int_to_ptr.vmem [resolvable:$true] %s18_s13 }
   0x4   :  { %s404_s14 = scalar_lea.vmem %s19_s13, 16384  ;;  %p409_p1 = scmp.lt.s32.totalorder %s19_s13, %s19_s13 }
   0x5   :  { %p405_p0 = scmp.ne.s32.totalorder %s19_s13, %s404_s14  ;;  %p410_p2 = scmp.lt.s32.totalorder %s404_s14, %s404_s14 }
   0x7   :  { %p411_p3 = por %p410_p2, %p409_p1 }
   0x9   :  { %p412_p4 = pnand %p411_p3, %p405_p0 }
   0xb   :  { %415 = shalt.err (!%p412_p4)
}
   0xc   :  { %s463_s15 = smov 256   ;;  %s464_s16 = smov 16  }
   0xd   :  { %24 = dma.hbm_to_vmem [thread:$0]  %s506_s1, 16384, %s19_s13, [#allocation3], %s463_s15, %s463_s15, %s464_s16  }
   0xe   :  { %s465_s19 = smov [#allocation5]  }
   0xf   :  { %s31_s20 = sshll.u32 %s465_s19, 4  ;;  %s32_s20 = int_to_ptr.vmem [resolvable:$true] %s31_s20 }
  0x10   :  { %s424_s21 = scalar_lea.vmem %s32_s20, 32  ;;  %p429_p6 = scmp.lt.s32.totalorder %s32_s20, %s32_s20 }
  0x11   :  { %p425_p5 = scmp.ne.s32.totalorder %s32_s20, %s424_s21  ;;  %p430_p7 = scmp.lt.s32.totalorder %s424_s21, %s424_s21 }
  0x13   :  { %p431_p8 = por %p430_p7, %p429_p6 }
  0x15   :  { %p432_p9 = pnand %p431_p8, %p425_p5 }
  0x17   :  { %435 = shalt.err (!%p432_p9)
}
  0x18   :  { %34 = dma.hbm_to_vmem [thread:$0]  %s507_s2, 32, %s32_s20, [#allocation6]  }
  0x19   :  { %456 = dma.done.wait [#allocation3], 16384  }
  0x1a   :  { %457 = vsyncadd [#allocation3], 4294950912 }
  0x1b   :  { %458 = dma.done.wait [#allocation6], 32  }
  0x1c   :  { %459 = vsyncadd [#allocation6], 4294967264  ;;  %v73_v0 = vld [vmem:[#allocation2 + $0xf8] sm:$0xff]  ;;  %v72_v2 = vld [vmem:[#allocation2 + $0xf0] sm:$0xff]  ;;  %vm348_vm0 = vcmask 1041408  }
  0x1d   :  { %v137_v1 = vld [vmem:[#allocation2 + $0x2f8] sm:$0xff]  ;;  %204 = vmatprep.subr.mxu0 %v73_v0  ;;  %v136_v3 = vld [vmem:[#allocation2 + $0x2f0] sm:$0xff]  ;;  %v71_v4 = vld [vmem:[#allocation2 + $0xe8] sm:$0xff] }
  0x1e   :  { %275 = vmatprep.subr.mxu1 %v137_v1  ;;  %v135_v5 = vld [vmem:[#allocation2 + $0x2e8] sm:$0xff]  ;;  %205 = vmatpush1.msra.mxu0 %v72_v2  ;;  %v70_v6 = vld [vmem:[#allocation2 + $0xe0] sm:$0xff]  ;;  %v69_v8 = vld [vmem:[#allocation2 + $0xd8] sm:$0xff] }
  0x1f   :  { %276 = vmatpush1.msra.mxu1 %v136_v3  ;;  %v134_v7 = vld [vmem:[#allocation2 + $0x2e0] sm:$0xff]  ;;  %206 = vmatprep.subr.mxu0 %v71_v4  ;;  %v133_v9 = vld [vmem:[#allocation2 + $0x2d8] sm:$0xff]  ;;  %v68_v10 = vld [vmem:[#allocation2 + $0xd0] sm:$0xff] }
  0x20   :  { %277 = vmatprep.subr.mxu1 %v135_v5  ;;  %v132_v11 = vld [vmem:[#allocation2 + $0x2d0] sm:$0xff]  ;;  %207 = vmatpush1.msra.mxu0 %v70_v6  ;;  %v67_v12 = vld [vmem:[#allocation2 + $0xc8] sm:$0xff]  ;;  %v66_v14 = vld [vmem:[#allocation2 + $0xc0] sm:$0xff] }
  0x21   :  { %278 = vmatpush1.msra.mxu1 %v134_v7  ;;  %v131_v13 = vld [vmem:[#allocation2 + $0x2c8] sm:$0xff]  ;;  %208 = vmatprep.subr.mxu0 %v69_v8  ;;  %v130_v15 = vld [vmem:[#allocation2 + $0x2c0] sm:$0xff]  ;;  %v65_v16 = vld [vmem:[#allocation2 + $0xb8] sm:$0xff] }
  0x22   :  { %279 = vmatprep.subr.mxu1 %v133_v9  ;;  %209 = vmatpush1.msra.mxu0 %v68_v10  ;;  %v129_v17 = vld [vmem:[#allocation2 + $0x2b8] sm:$0xff]  ;;  %v64_v18 = vld [vmem:[#allocation2 + $0xb0] sm:$0xff]  ;;  %v63_v20 = vld [vmem:[#allocation2 + $0xa8] sm:$0xff] }
  0x23   :  { %280 = vmatpush1.msra.mxu1 %v132_v11  ;;  %210 = vmatprep.subr.mxu0 %v67_v12  ;;  %v128_v19 = vld [vmem:[#allocation2 + $0x2b0] sm:$0xff]  ;;  %v127_v21 = vld [vmem:[#allocation2 + $0x2a8] sm:$0xff]  ;;  %v62_v22 = vld [vmem:[#allocation2 + $0xa0] sm:$0xff] }
  0x24   :  { %281 = vmatprep.subr.mxu1 %v131_v13  ;;  %211 = vmatpush1.msra.mxu0 %v66_v14  ;;  %v126_v23 = vld [vmem:[#allocation2 + $0x2a0] sm:$0xff]  ;;  %v61_v24 = vld [vmem:[#allocation2 + $0x98] sm:$0xff]  ;;  %v60_v26 = vld [vmem:[#allocation2 + $0x90] sm:$0xff] }
  0x25   :  { %282 = vmatpush1.msra.mxu1 %v130_v15  ;;  %212 = vmatprep.subr.mxu0 %v65_v16  ;;  %v125_v25 = vld [vmem:[#allocation2 + $0x298] sm:$0xff]  ;;  %v124_v27 = vld [vmem:[#allocation2 + $0x290] sm:$0xff]  ;;  %v59_v28 = vld [vmem:[#allocation2 + $0x88] sm:$0xff] }
  0x26   :  { %283 = vmatprep.subr.mxu1 %v129_v17  ;;  %213 = vmatpush1.msra.mxu0 %v64_v18  ;;  %v123_v29 = vld [vmem:[#allocation2 + $0x288] sm:$0xff]  ;;  %v58_v30 = vld [vmem:[#allocation2 + $0x80] sm:$0xff]  ;;  %v57_v32 = vld [vmem:[#allocation2 + $0x78] sm:$0xff] }
  0x27   :  { %284 = vmatpush1.msra.mxu1 %v128_v19  ;;  %214 = vmatprep.subr.mxu0 %v63_v20  ;;  %v122_v31 = vld [vmem:[#allocation2 + $0x280] sm:$0xff]  ;;  %v121_v33 = vld [vmem:[#allocation2 + $0x278] sm:$0xff]  ;;  %v56_v34 = vld [vmem:[#allocation2 + $0x70] sm:$0xff] }
  0x28   :  { %285 = vmatprep.subr.mxu1 %v127_v21  ;;  %215 = vmatpush1.msra.mxu0 %v62_v22  ;;  %v120_v35 = vld [vmem:[#allocation2 + $0x270] sm:$0xff]  ;;  %v55_v36 = vld [vmem:[#allocation2 + $0x68] sm:$0xff]  ;;  %v54_v38 = vld [vmem:[#allocation2 + $0x60] sm:$0xff] }
  0x29   :  { %286 = vmatpush1.msra.mxu1 %v126_v23  ;;  %216 = vmatprep.subr.mxu0 %v61_v24  ;;  %v119_v37 = vld [vmem:[#allocation2 + $0x268] sm:$0xff]  ;;  %v118_v39 = vld [vmem:[#allocation2 + $0x260] sm:$0xff]  ;;  %v53_v40 = vld [vmem:[#allocation2 + $0x58] sm:$0xff] }
  0x2a   :  { %287 = vmatprep.subr.mxu1 %v125_v25  ;;  %217 = vmatpush1.msra.mxu0 %v60_v26  ;;  %v117_v41 = vld [vmem:[#allocation2 + $0x258] sm:$0xff]  ;;  %v52_v42 = vld [vmem:[#allocation2 + $0x50] sm:$0xff]  ;;  %v51_v44 = vld [vmem:[#allocation2 + $0x48] sm:$0xff] }
  0x2b   :  { %288 = vmatpush1.msra.mxu1 %v124_v27  ;;  %218 = vmatprep.subr.mxu0 %v59_v28  ;;  %v116_v43 = vld [vmem:[#allocation2 + $0x250] sm:$0xff]  ;;  %v115_v45 = vld [vmem:[#allocation2 + $0x248] sm:$0xff]  ;;  %v50_v46 = vld [vmem:[#allocation2 + $0x40] sm:$0xff] }
  0x2c   :  { %289 = vmatprep.subr.mxu1 %v123_v29  ;;  %219 = vmatpush1.msra.mxu0 %v58_v30  ;;  %v114_v47 = vld [vmem:[#allocation2 + $0x240] sm:$0xff]  ;;  %v49_v48 = vld [vmem:[#allocation2 + $0x38] sm:$0xff]  ;;  %v48_v50 = vld [vmem:[#allocation2 + $0x30] sm:$0xff]  ;;  %v172_v30 = vlaneseq }
  0x2d   :  { %290 = vmatpush1.msra.mxu1 %v122_v31  ;;  %220 = vmatprep.subr.mxu0 %v57_v32  ;;  %v113_v49 = vld [vmem:[#allocation2 + $0x238] sm:$0xff]  ;;  %v112_v51 = vld [vmem:[#allocation2 + $0x230] sm:$0xff]  ;;  %v47_v52 = vld [vmem:[#allocation2 + $0x28] sm:$0xff]  ;;  %v466_v31 = vmov 1983009808  }
  0x2e   :  { %291 = vmatprep.subr.mxu1 %v121_v33  ;;  %221 = vmatpush1.msra.mxu0 %v56_v34  ;;  %v111_v53 = vld [vmem:[#allocation2 + $0x228] sm:$0xff]  ;;  %v46_v54 = vld [vmem:[#allocation2 + $0x20] sm:$0xff]  ;;  %v45_v56 = vld [vmem:[#allocation2 + $0x18] sm:$0xff]  ;;  %v185_v32 = vunpack.c.l.s4 %v466_v31 }
  0x2f   :  { %292 = vmatpush1.msra.mxu1 %v120_v35  ;;  %222 = vmatprep.subr.mxu0 %v55_v36  ;;  %v110_v55 = vld [vmem:[#allocation2 + $0x220] sm:$0xff]  ;;  %v109_v57 = vld [vmem:[#allocation2 + $0x218] sm:$0xff]  ;;  %v44_v58 = vld [vmem:[#allocation2 + $0x10] sm:$0xff] }
  0x30   :  { %293 = vmatprep.subr.mxu1 %v119_v37  ;;  %223 = vmatpush1.msra.mxu0 %v54_v38  ;;  %v108_v59 = vld [vmem:[#allocation2 + $0x210] sm:$0xff]  ;;  %v43_v60 = vld [vmem:[#allocation2 + $0x8] sm:$0xff]  ;;  %v42_v62 = vld [vmem:[#allocation2] sm:$0xff] }
  0x31   :  { %294 = vmatpush1.msra.mxu1 %v118_v39  ;;  %224 = vmatprep.subr.mxu0 %v53_v40  ;;  %v107_v61 = vld [vmem:[#allocation2 + $0x208] sm:$0xff]  ;;  %v106_v63 = vld [vmem:[#allocation2 + $0x200] sm:$0xff]  ;;  %v105_v0 = vld [vmem:[#allocation2 + $0x1f8] sm:$0xff] }
  0x32   :  { %295 = vmatprep.subr.mxu1 %v117_v41  ;;  %225 = vmatpush1.msra.mxu0 %v52_v42  ;;  %v169_v1 = vld [vmem:[#allocation2 + $0x3f8] sm:$0xff]  ;;  %v104_v2 = vld [vmem:[#allocation2 + $0x1f0] sm:$0xff]  ;;  %v103_v4 = vld [vmem:[#allocation2 + $0x1e8] sm:$0xff]  ;;  %v494_v41 = vshrl.u32 %v172_v30, 7  ;;  %v186_v42 = vunpack.c.0.s8 %v185_v32 }
  0x33   :  { %296 = vmatpush1.msra.mxu1 %v116_v43  ;;  %226 = vmatprep.subr.mxu0 %v51_v44  ;;  %v168_v3 = vld [vmem:[#allocation2 + $0x3f0] sm:$0xff]  ;;  %v167_v5 = vld [vmem:[#allocation2 + $0x3e8] sm:$0xff]  ;;  %v102_v6 = vld [vmem:[#allocation2 + $0x1e0] sm:$0xff] }
  0x34   :  { %297 = vmatprep.subr.mxu1 %v115_v45  ;;  %227 = vmatpush1.msra.mxu0 %v50_v46  ;;  %v166_v7 = vld [vmem:[#allocation2 + $0x3e0] sm:$0xff]  ;;  %v101_v8 = vld [vmem:[#allocation2 + $0x1d8] sm:$0xff]  ;;  %v100_v10 = vld [vmem:[#allocation2 + $0x1d0] sm:$0xff] }
  0x35   :  { %298 = vmatpush1.msra.mxu1 %v114_v47  ;;  %228 = vmatprep.subr.mxu0 %v49_v48  ;;  %v165_v9 = vld [vmem:[#allocation2 + $0x3d8] sm:$0xff]  ;;  %v164_v11 = vld [vmem:[#allocation2 + $0x3d0] sm:$0xff]  ;;  %v99_v12 = vld [vmem:[#allocation2 + $0x1c8] sm:$0xff] }
  0x36   :  { %299 = vmatprep.subr.mxu1 %v113_v49  ;;  %229 = vmatpush1.msra.mxu0 %v48_v50  ;;  %v163_v13 = vld [vmem:[#allocation2 + $0x3c8] sm:$0xff]  ;;  %v98_v14 = vld [vmem:[#allocation2 + $0x1c0] sm:$0xff]  ;;  %v97_v16 = vld [vmem:[#allocation2 + $0x1b8] sm:$0xff] }
  0x37   :  { %300 = vmatpush1.msra.mxu1 %v112_v51  ;;  %230 = vmatprep.subr.mxu0 %v47_v52  ;;  %v162_v15 = vld [vmem:[#allocation2 + $0x3c0] sm:$0xff]  ;;  %v161_v17 = vld [vmem:[#allocation2 + $0x3b8] sm:$0xff]  ;;  %v96_v18 = vld [vmem:[#allocation2 + $0x1b0] sm:$0xff]  ;;  %v189_v52 = vsub.s32 %v186_v42, %v494_v41 }
  0x38   :  { %301 = vmatprep.subr.mxu1 %v111_v53  ;;  %231 = vmatpush1.msra.mxu0 %v46_v54  ;;  %v160_v19 = vld [vmem:[#allocation2 + $0x3b0] sm:$0xff]  ;;  %v95_v20 = vld [vmem:[#allocation2 + $0x1a8] sm:$0xff]  ;;  %v94_v22 = vld [vmem:[#allocation2 + $0x1a0] sm:$0xff] }
  0x39   :  { %302 = vmatpush1.msra.mxu1 %v110_v55  ;;  %232 = vmatprep.subr.mxu0 %v45_v56  ;;  %v159_v21 = vld [vmem:[#allocation2 + $0x3a8] sm:$0xff]  ;;  %v158_v23 = vld [vmem:[#allocation2 + $0x3a0] sm:$0xff]  ;;  %v93_v24 = vld [vmem:[#allocation2 + $0x198] sm:$0xff] }
  0x3a   :  { %303 = vmatprep.subr.mxu1 %v109_v57  ;;  %233 = vmatpush1.msra.mxu0 %v44_v58  ;;  %v157_v25 = vld [vmem:[#allocation2 + $0x398] sm:$0xff]  ;;  %v92_v26 = vld [vmem:[#allocation2 + $0x190] sm:$0xff]  ;;  %v91_v28 = vld [vmem:[#allocation2 + $0x188] sm:$0xff] }
  0x3b   :  { %304 = vmatpush1.msra.mxu1 %v108_v59  ;;  %234 = vmatprep.subr.mxu0 %v43_v60  ;;  %v156_v27 = vld [vmem:[#allocation2 + $0x390] sm:$0xff]  ;;  %v155_v29 = vld [vmem:[#allocation2 + $0x388] sm:$0xff]  ;;  %v90_v33 = vld [vmem:[#allocation2 + $0x180] sm:$0xff] }
  0x3c   :  { %305 = vmatprep.subr.mxu1 %v107_v61  ;;  %235 = vmatpush1.msra.mxu0 %v42_v62  ;;  %v154_v34 = vld [vmem:[#allocation2 + $0x380] sm:$0xff]  ;;  %v89_v35 = vld [vmem:[#allocation2 + $0x178] sm:$0xff]  ;;  %v88_v37 = vld [vmem:[#allocation2 + $0x170] sm:$0xff] }
  0x3d   :  { %306 = vmatpush1.msra.mxu1 %v106_v63  ;;  %236 = vmatprep.subr.mxu0 %v105_v0  ;;  %v153_v36 = vld [vmem:[#allocation2 + $0x378] sm:$0xff]  ;;  %v152_v38 = vld [vmem:[#allocation2 + $0x370] sm:$0xff]  ;;  %v87_v39 = vld [vmem:[#allocation2 + $0x168] sm:$0xff] }
  0x3e   :  { %307 = vmatprep.subr.mxu1 %v169_v1  ;;  %237 = vmatpush2.msra.mxu0 %v104_v2  ;;  %v151_v40 = vld [vmem:[#allocation2 + $0x368] sm:$0xff]  ;;  %v86_v43 = vld [vmem:[#allocation2 + $0x160] sm:$0xff]  ;;  %v85_v45 = vld [vmem:[#allocation2 + $0x158] sm:$0xff] }
  0x3f   :  { %308 = vmatpush2.msra.mxu1 %v168_v3  ;;  %238 = vmatprep.subr.mxu0 %v103_v4  ;;  %v150_v44 = vld [vmem:[#allocation2 + $0x360] sm:$0xff]  ;;  %v149_v46 = vld [vmem:[#allocation2 + $0x358] sm:$0xff]  ;;  %v84_v48 = vld [vmem:[#allocation2 + $0x150] sm:$0xff] }
  0x40   :  { %309 = vmatprep.subr.mxu1 %v167_v5  ;;  %239 = vmatpush2.msra.mxu0 %v102_v6  ;;  %v41_v47 = vld [vmem:[%s505_s0] sm:$0xff]  ;;  %v148_v49 = vld [vmem:[#allocation2 + $0x350] sm:$0xff]  ;;  %v83_v50 = vld [vmem:[#allocation2 + $0x148] sm:$0xff]  ;;  %s467_s0 = smov [#allocation7]  }
  0x41   :  { %310 = vmatpush2.msra.mxu1 %v166_v7  ;;  %240 = vmatprep.subr.mxu0 %v101_v8  ;;  %v147_v51 = vld [vmem:[#allocation2 + $0x348] sm:$0xff]  ;;  %v82_v53 = vld [vmem:[#allocation2 + $0x140] sm:$0xff]  ;;  %v183_v55 = vcombine.high %v41_v47, %v41_v47  ;;  %v81_v56 = vld [vmem:[#allocation2 + $0x138] sm:$0xff]  ;;  %v190_v62 = vrot.slane %v41_v47, %v189_v52  ;;  %s376_s24 = sshll.u32 %s467_s0, 4  ;;  %s377_s24 = int_to_ptr.vmem [resolvable:$true] %s376_s24 }
  0x42   :  { %311 = vmatprep.subr.mxu1 %v165_v9  ;;  %241 = vmatpush2.msra.mxu0 %v100_v10  ;;  %v146_v54 = vld [vmem:[#allocation2 + $0x340] sm:$0xff]  ;;  %v145_v57 = vld [vmem:[#allocation2 + $0x338] sm:$0xff]  ;;  %v80_v58 = vld [vmem:[#allocation2 + $0x130] sm:$0xff]  ;;  %s436_s25 = scalar_lea.vmem %s377_s24, 64  ;;  %p441_p11 = scmp.lt.s32.totalorder %s377_s24, %s377_s24 }
  0x43   :  { %312 = vmatpush2.msra.mxu1 %v164_v11  ;;  %242 = vmatprep.subr.mxu0 %v99_v12  ;;  %v144_v59 = vld [vmem:[#allocation2 + $0x330] sm:$0xff]  ;;  %v79_v60 = vld [vmem:[#allocation2 + $0x128] sm:$0xff]  ;;  %v78_v63 = vld [vmem:[#allocation2 + $0x120] sm:$0xff]  ;;  %v197_v1 = vrot.slane %v183_v55, %v189_v52  ;;  %v198_v8 = vcombine.high %v190_v62, %v190_v62  ;;  %v174_v12 = vsub.s32 0, %v494_v41  ;;  %p437_p10 = scmp.ne.s32.totalorder %s377_s24, %s436_s25  ;;  %p442_p12 = scmp.lt.s32.totalorder %s436_s25, %s436_s25 }
  0x44   :  { %313 = vmatprep.subr.mxu1 %v163_v13  ;;  %243 = vmatpush2.msra.mxu0 %v98_v14  ;;  %v143_v61 = vld [vmem:[#allocation2 + $0x328] sm:$0xff]  ;;  %v142_v0 = vld [vmem:[#allocation2 + $0x320] sm:$0xff]  ;;  %v77_v2 = vld [vmem:[#allocation2 + $0x118] sm:$0xff]  ;;  %v178_v14 = vsub.s32 1, %v494_v41 }
  0x45   :  { %314 = vmatpush2.msra.mxu1 %v162_v15  ;;  %244 = vmatprep.subr.mxu0 %v97_v16  ;;  %v141_v3 = vld [vmem:[#allocation2 + $0x318] sm:$0xff]  ;;  %v76_v4 = vld [vmem:[#allocation2 + $0x110] sm:$0xff]  ;;  %v75_v6 = vld [vmem:[#allocation2 + $0x108] sm:$0xff]  ;;  %v199_v10 = vcombine.high %v197_v1, %v197_v1  ;;  %p443_p13 = por %p442_p12, %p441_p11 }
  0x46   :  { %315 = vmatprep.subr.mxu1 %v161_v17  ;;  %245 = vmatpush2.msra.mxu0 %v96_v18  ;;  %v140_v5 = vld [vmem:[#allocation2 + $0x310] sm:$0xff]  ;;  %v139_v7 = vld [vmem:[#allocation2 + $0x308] sm:$0xff]  ;;  %v74_v9 = vld [vmem:[#allocation2 + $0x100] sm:$0xff] }
  0x47   :  { %316 = vmatpush2.msra.mxu1 %v160_v19  ;;  %246 = vmatprep.subr.mxu0 %v95_v20  ;;  %v138_v11 = vld [vmem:[#allocation2 + $0x300] sm:$0xff]  ;;  %p444_p0 = pnand %p443_p13, %p437_p10 }
  0x48   :  { %317 = vmatprep.subr.mxu1 %v159_v21  ;;  %247 = vmatpush2.msra.mxu0 %v94_v22  ;;  %v170_v13 = vld [vmem:[#allocation5] sm:$0x3] }
  0x49   :  { %318 = vmatpush2.msra.mxu1 %v158_v23  ;;  %248 = vmatprep.subr.mxu0 %v93_v24  ;;  %v175_v15 = vrot.slane %v170_v13, %v174_v12  ;;  %v179_v16 = vrot.slane %v170_v13, %v178_v14 }
  0x4a   :  { %319 = vmatprep.subr.mxu1 %v157_v25  ;;  %249 = vmatpush2.msra.mxu0 %v92_v26 }
  0x4b   :  { %320 = vmatpush2.msra.mxu1 %v156_v27  ;;  %250 = vmatprep.subr.mxu0 %v91_v28 }
  0x4c   :  { %321 = vmatprep.subr.mxu1 %v155_v29  ;;  %251 = vmatpush2.msra.mxu0 %v90_v33 }
  0x4d   :  { %322 = vmatpush2.msra.mxu1 %v154_v34  ;;  %252 = vmatprep.subr.mxu0 %v89_v35 }
  0x4e   :  { %323 = vmatprep.subr.mxu1 %v153_v36  ;;  %253 = vmatpush2.msra.mxu0 %v88_v37 }
  0x4f   :  { %324 = vmatpush2.msra.mxu1 %v152_v38  ;;  %254 = vmatprep.subr.mxu0 %v87_v39 }
  0x50   :  { %325 = vmatprep.subr.mxu1 %v151_v40  ;;  %255 = vmatpush2.msra.mxu0 %v86_v43 }
  0x51   :  { %326 = vmatpush2.msra.mxu1 %v150_v44  ;;  %256 = vmatprep.subr.mxu0 %v85_v45 }
  0x52   :  { %327 = vmatprep.subr.mxu1 %v149_v46  ;;  %257 = vmatpush2.msra.mxu0 %v84_v48 }
  0x53   :  { %328 = vmatpush2.msra.mxu1 %v148_v49  ;;  %258 = vmatprep.subr.mxu0 %v83_v50 }
  0x54   :  { %329 = vmatprep.subr.mxu1 %v147_v51  ;;  %259 = vmatpush2.msra.mxu0 %v82_v53 }
  0x55   :  { %330 = vmatpush2.msra.mxu1 %v146_v54  ;;  %260 = vmatprep.subr.mxu0 %v81_v56 }
  0x56   :  { %331 = vmatprep.subr.mxu1 %v145_v57  ;;  %261 = vmatpush2.msra.mxu0 %v80_v58 }
  0x57   :  { %332 = vmatpush2.msra.mxu1 %v144_v59  ;;  %262 = vmatprep.subr.mxu0 %v79_v60 }
  0x58   :  { %333 = vmatprep.subr.mxu1 %v143_v61  ;;  %263 = vmatpush2.msra.mxu0 %v78_v63 }
  0x59   :  { %334 = vmatpush2.msra.mxu1 %v142_v0  ;;  %264 = vmatprep.subr.mxu0 %v77_v2 }
  0x5a   :  { %335 = vmatprep.subr.mxu1 %v141_v3  ;;  %265 = vmatpush2.msra.mxu0 %v76_v4 }
  0x5b   :  { %336 = vmatpush2.msra.mxu1 %v140_v5  ;;  %266 = vmatprep.subr.mxu0 %v75_v6 }
  0x5c   :  { %337 = vmatprep.subr.mxu1 %v139_v7  ;;  %267 = vmatpush2.msra.mxu0 %v74_v9 }
  0x5d   :  { %268 = vmatprep.mubr.f32.mxu0 %v198_v8  ;;  %338 = vmatpush2.msra.mxu1 %v138_v11 }
  0x5e   :  { %339 = vmatprep.mubr.f32.mxu1 %v199_v10  ;;  %269 = vmatmul.mubr.f32.vlgmr.msra.gmra.mxu0 %v190_v62 }
  0x5f   :  { %340 = vmatmul.mubr.f32.vlgmr.msra.gmra.mxu1 %v197_v1 }
 0x11e   :  { %v270_v17 = vpop.f32.mrf.mxu0 }
 0x11f   :  { %v341_v18 = vpop.f32.mrf.mxu1  ;;  %v271_v19 = vadd.f32 %v270_v17, %v175_v15 }
 0x120   :  { %v272_v20 = vpop.f32.mrf.mxu0 }
 0x121   :  { %v342_v21 = vadd.f32 %v341_v18, %v271_v19  ;;  %v273_v22 = vadd.f32 %v272_v20, %v179_v16  ;;  %v343_v23 = vpop.f32.mrf.mxu1 }
 0x123   :  { %v346_v24 = vmul.f32 %v342_v21, %v342_v21  ;;  %v344_v25 = vadd.f32 %v343_v23, %v273_v22 }
 0x125   :  { %v347_v26 = vmul.f32 %v344_v25, %v344_v25  ;;  %v349_v27 = vsel %vm348_vm0, %v346_v24, 0.0 }
 0x127   :  { %v350_v28 = vsel %vm348_vm0, %v347_v26, 0.0 }
 0x128   :  { %v351_v29 = vadd.f32 %v350_v28, %v349_v27 }
 0x12a   :  { %352 = vadd.xlane.f32.xlu0 %v351_v29 }
 0x1b3   :  { %v353_v30 = vpop.xlane.xlu0 %352 }
 0x1b4   :  { %v354_v31 = vmax.f32 %v353_v30, 1e-24 }
 0x1b6   :  { %394 = vrsqrt.f32 %v354_v31 }
 0x1c3   :  { %v395_v32 = vpop.eup %394 }
 0x1c4   :  { %v356_v33 = vmul.f32 %v395_v32, %v342_v21  ;;  %v357_v34 = vmul.f32 %v395_v32, %v344_v25 }
 0x1c6   :  { %v360_v35 = vcombine.low %v356_v33, %v357_v34 }
 0x1c8   :  { %386 = vst.sshfl [vmem:[#allocation7] sm:$0x33 pattern:$0x76325410] %v360_v35 }
 0x1c9   :  { %447 = shalt.err (!%p444_p0)
}
 0x1ca   :  { %379 = dma.vmem_to_hbm [thread:$0]  %s377_s24, 64, %s508_s3, [#allocation4]  }
 0x1cb   :  { %460 = dma.done.wait [#allocation4], 64  }
 0x1cc   :  { %461 = vsyncadd [#allocation4], 4294967232 }
 0x1cd   :  { %383 = vsyncpa [#allocation3], 1 }
 0x1ce   :  { %384 = vsyncpa [#allocation6], 1 }
 0x1cf   :  { %385 = vsyncpa [#allocation4], 1 }

// kernel: gdt_forward.3
= control target key start
LH: loop header
LB: loop body
LE: loop exit
PB: predicated region body
PF: predicated region fallthrough
CT: control target
= control target key end

     0   :  { %s806_s0 = inlined_call_operand.vmem [shape: f32[2,512], index: 0, kind: input, shape index: {}]   ;;  %s807_s1 = inlined_call_operand.vmem [shape: f32[512,256], index: 1, kind: input, shape index: {}]   ;;  %s808_s2 = inlined_call_operand.vmem [shape: f32[1,256], index: 2, kind: input, shape index: {}]   ;;  %s809_s3 = inlined_call_operand.hbm [shape: f32[2,256], index: 3, kind: output, shape index: {}]  }
   0x1   :  { %v47_v0 = vld [vmem:[%s807_s1 + $0xf8] sm:$0xff]  ;;  %v46_v2 = vld [vmem:[%s807_s1 + $0xf0] sm:$0xff]  ;;  %v45_v4 = vld [vmem:[%s807_s1 + $0xe8] sm:$0xff] }
   0x2   :  { %v111_v1 = vld [vmem:[%s807_s1 + $0x2f8] sm:$0xff]  ;;  %178 = vmatprep.subr.mxu0 %v47_v0  ;;  %v110_v3 = vld [vmem:[%s807_s1 + $0x2f0] sm:$0xff]  ;;  %v109_v5 = vld [vmem:[%s807_s1 + $0x2e8] sm:$0xff] }
   0x3   :  { %249 = vmatprep.subr.mxu1 %v111_v1  ;;  %179 = vmatpush1.msra.mxu0 %v46_v2  ;;  %v44_v6 = vld [vmem:[%s807_s1 + $0xe0] sm:$0xff]  ;;  %v43_v8 = vld [vmem:[%s807_s1 + $0xd8] sm:$0xff]  ;;  %v42_v10 = vld [vmem:[%s807_s1 + $0xd0] sm:$0xff] }
   0x4   :  { %250 = vmatpush1.msra.mxu1 %v110_v3  ;;  %v108_v7 = vld [vmem:[%s807_s1 + $0x2e0] sm:$0xff]  ;;  %180 = vmatprep.subr.mxu0 %v45_v4  ;;  %v107_v9 = vld [vmem:[%s807_s1 + $0x2d8] sm:$0xff]  ;;  %v106_v11 = vld [vmem:[%s807_s1 + $0x2d0] sm:$0xff] }
   0x5   :  { %251 = vmatprep.subr.mxu1 %v109_v5  ;;  %181 = vmatpush1.msra.mxu0 %v44_v6  ;;  %v41_v12 = vld [vmem:[%s807_s1 + $0xc8] sm:$0xff]  ;;  %v40_v14 = vld [vmem:[%s807_s1 + $0xc0] sm:$0xff]  ;;  %v39_v16 = vld [vmem:[%s807_s1 + $0xb8] sm:$0xff] }
   0x6   :  { %252 = vmatpush1.msra.mxu1 %v108_v7  ;;  %v105_v13 = vld [vmem:[%s807_s1 + $0x2c8] sm:$0xff]  ;;  %182 = vmatprep.subr.mxu0 %v43_v8  ;;  %v104_v15 = vld [vmem:[%s807_s1 + $0x2c0] sm:$0xff]  ;;  %v103_v17 = vld [vmem:[%s807_s1 + $0x2b8] sm:$0xff] }
   0x7   :  { %253 = vmatprep.subr.mxu1 %v107_v9  ;;  %183 = vmatpush1.msra.mxu0 %v42_v10  ;;  %v38_v18 = vld [vmem:[%s807_s1 + $0xb0] sm:$0xff]  ;;  %v37_v20 = vld [vmem:[%s807_s1 + $0xa8] sm:$0xff]  ;;  %v36_v22 = vld [vmem:[%s807_s1 + $0xa0] sm:$0xff] }
   0x8   :  { %254 = vmatpush1.msra.mxu1 %v106_v11  ;;  %184 = vmatprep.subr.mxu0 %v41_v12  ;;  %v102_v19 = vld [vmem:[%s807_s1 + $0x2b0] sm:$0xff]  ;;  %v101_v21 = vld [vmem:[%s807_s1 + $0x2a8] sm:$0xff]  ;;  %v100_v23 = vld [vmem:[%s807_s1 + $0x2a0] sm:$0xff] }
   0x9   :  { %255 = vmatprep.subr.mxu1 %v105_v13  ;;  %185 = vmatpush1.msra.mxu0 %v40_v14  ;;  %v35_v24 = vld [vmem:[%s807_s1 + $0x98] sm:$0xff]  ;;  %v34_v26 = vld [vmem:[%s807_s1 + $0x90] sm:$0xff]  ;;  %v33_v28 = vld [vmem:[%s807_s1 + $0x88] sm:$0xff] }
   0xa   :  { %256 = vmatpush1.msra.mxu1 %v104_v15  ;;  %186 = vmatprep.subr.mxu0 %v39_v16  ;;  %v99_v25 = vld [vmem:[%s807_s1 + $0x298] sm:$0xff]  ;;  %v98_v27 = vld [vmem:[%s807_s1 + $0x290] sm:$0xff]  ;;  %v97_v29 = vld [vmem:[%s807_s1 + $0x288] sm:$0xff] }
   0xb   :  { %257 = vmatprep.subr.mxu1 %v103_v17  ;;  %187 = vmatpush1.msra.mxu0 %v38_v18  ;;  %v32_v30 = vld [vmem:[%s807_s1 + $0x80] sm:$0xff]  ;;  %v31_v32 = vld [vmem:[%s807_s1 + $0x78] sm:$0xff]  ;;  %v30_v34 = vld [vmem:[%s807_s1 + $0x70] sm:$0xff] }
   0xc   :  { %258 = vmatpush1.msra.mxu1 %v102_v19  ;;  %188 = vmatprep.subr.mxu0 %v37_v20  ;;  %v96_v31 = vld [vmem:[%s807_s1 + $0x280] sm:$0xff]  ;;  %v95_v33 = vld [vmem:[%s807_s1 + $0x278] sm:$0xff]  ;;  %v94_v35 = vld [vmem:[%s807_s1 + $0x270] sm:$0xff] }
   0xd   :  { %259 = vmatprep.subr.mxu1 %v101_v21  ;;  %189 = vmatpush1.msra.mxu0 %v36_v22  ;;  %v29_v36 = vld [vmem:[%s807_s1 + $0x68] sm:$0xff]  ;;  %v28_v38 = vld [vmem:[%s807_s1 + $0x60] sm:$0xff]  ;;  %v27_v40 = vld [vmem:[%s807_s1 + $0x58] sm:$0xff] }
   0xe   :  { %260 = vmatpush1.msra.mxu1 %v100_v23  ;;  %190 = vmatprep.subr.mxu0 %v35_v24  ;;  %v93_v37 = vld [vmem:[%s807_s1 + $0x268] sm:$0xff]  ;;  %v92_v39 = vld [vmem:[%s807_s1 + $0x260] sm:$0xff]  ;;  %v91_v41 = vld [vmem:[%s807_s1 + $0x258] sm:$0xff] }
   0xf   :  { %261 = vmatprep.subr.mxu1 %v99_v25  ;;  %191 = vmatpush1.msra.mxu0 %v34_v26  ;;  %v26_v42 = vld [vmem:[%s807_s1 + $0x50] sm:$0xff]  ;;  %v25_v44 = vld [vmem:[%s807_s1 + $0x48] sm:$0xff]  ;;  %v24_v46 = vld [vmem:[%s807_s1 + $0x40] sm:$0xff] }
  0x10   :  { %262 = vmatpush1.msra.mxu1 %v98_v27  ;;  %192 = vmatprep.subr.mxu0 %v33_v28  ;;  %v90_v43 = vld [vmem:[%s807_s1 + $0x250] sm:$0xff]  ;;  %v89_v45 = vld [vmem:[%s807_s1 + $0x248] sm:$0xff]  ;;  %v88_v47 = vld [vmem:[%s807_s1 + $0x240] sm:$0xff] }
  0x11   :  { %263 = vmatprep.subr.mxu1 %v97_v29  ;;  %193 = vmatpush1.msra.mxu0 %v32_v30  ;;  %v23_v48 = vld [vmem:[%s807_s1 + $0x38] sm:$0xff]  ;;  %v22_v50 = vld [vmem:[%s807_s1 + $0x30] sm:$0xff]  ;;  %v21_v52 = vld [vmem:[%s807_s1 + $0x28] sm:$0xff] }
  0x12   :  { %264 = vmatpush1.msra.mxu1 %v96_v31  ;;  %194 = vmatprep.subr.mxu0 %v31_v32  ;;  %v87_v49 = vld [vmem:[%s807_s1 + $0x238] sm:$0xff]  ;;  %v86_v51 = vld [vmem:[%s807_s1 + $0x230] sm:$0xff]  ;;  %v85_v53 = vld [vmem:[%s807_s1 + $0x228] sm:$0xff] }
  0x13   :  { %265 = vmatprep.subr.mxu1 %v95_v33  ;;  %195 = vmatpush1.msra.mxu0 %v30_v34  ;;  %v20_v54 = vld [vmem:[%s807_s1 + $0x20] sm:$0xff]  ;;  %v19_v56 = vld [vmem:[%s807_s1 + $0x18] sm:$0xff]  ;;  %v18_v58 = vld [vmem:[%s807_s1 + $0x10] sm:$0xff] }
  0x14   :  { %266 = vmatpush1.msra.mxu1 %v94_v35  ;;  %196 = vmatprep.subr.mxu0 %v29_v36  ;;  %v84_v55 = vld [vmem:[%s807_s1 + $0x220] sm:$0xff]  ;;  %v83_v57 = vld [vmem:[%s807_s1 + $0x218] sm:$0xff]  ;;  %v82_v59 = vld [vmem:[%s807_s1 + $0x210] sm:$0xff] }
  0x15   :  { %267 = vmatprep.subr.mxu1 %v93_v37  ;;  %197 = vmatpush1.msra.mxu0 %v28_v38  ;;  %v17_v60 = vld [vmem:[%s807_s1 + $0x8] sm:$0xff]  ;;  %v16_v62 = vld [vmem:[%s807_s1] sm:$0xff]  ;;  %v79_v0 = vld [vmem:[%s807_s1 + $0x1f8] sm:$0xff] }
  0x16   :  { %268 = vmatpush1.msra.mxu1 %v92_v39  ;;  %198 = vmatprep.subr.mxu0 %v27_v40  ;;  %v81_v61 = vld [vmem:[%s807_s1 + $0x208] sm:$0xff]  ;;  %v80_v63 = vld [vmem:[%s807_s1 + $0x200] sm:$0xff]  ;;  %v143_v1 = vld [vmem:[%s807_s1 + $0x3f8] sm:$0xff] }
  0x17   :  { %269 = vmatprep.subr.mxu1 %v91_v41  ;;  %199 = vmatpush1.msra.mxu0 %v26_v42  ;;  %v78_v2 = vld [vmem:[%s807_s1 + $0x1f0] sm:$0xff]  ;;  %v77_v4 = vld [vmem:[%s807_s1 + $0x1e8] sm:$0xff]  ;;  %v76_v6 = vld [vmem:[%s807_s1 + $0x1e0] sm:$0xff] }
  0x18   :  { %270 = vmatpush1.msra.mxu1 %v90_v43  ;;  %200 = vmatprep.subr.mxu0 %v25_v44  ;;  %v142_v3 = vld [vmem:[%s807_s1 + $0x3f0] sm:$0xff]  ;;  %v141_v5 = vld [vmem:[%s807_s1 + $0x3e8] sm:$0xff]  ;;  %v140_v7 = vld [vmem:[%s807_s1 + $0x3e0] sm:$0xff] }
  0x19   :  { %271 = vmatprep.subr.mxu1 %v89_v45  ;;  %201 = vmatpush1.msra.mxu0 %v24_v46  ;;  %v75_v8 = vld [vmem:[%s807_s1 + $0x1d8] sm:$0xff]  ;;  %v74_v10 = vld [vmem:[%s807_s1 + $0x1d0] sm:$0xff]  ;;  %v73_v12 = vld [vmem:[%s807_s1 + $0x1c8] sm:$0xff] }
  0x1a   :  { %272 = vmatpush1.msra.mxu1 %v88_v47  ;;  %202 = vmatprep.subr.mxu0 %v23_v48  ;;  %v139_v9 = vld [vmem:[%s807_s1 + $0x3d8] sm:$0xff]  ;;  %v138_v11 = vld [vmem:[%s807_s1 + $0x3d0] sm:$0xff]  ;;  %v137_v13 = vld [vmem:[%s807_s1 + $0x3c8] sm:$0xff] }
  0x1b   :  { %273 = vmatprep.subr.mxu1 %v87_v49  ;;  %203 = vmatpush1.msra.mxu0 %v22_v50  ;;  %v72_v14 = vld [vmem:[%s807_s1 + $0x1c0] sm:$0xff]  ;;  %v71_v16 = vld [vmem:[%s807_s1 + $0x1b8] sm:$0xff]  ;;  %v70_v18 = vld [vmem:[%s807_s1 + $0x1b0] sm:$0xff] }
  0x1c   :  { %274 = vmatpush1.msra.mxu1 %v86_v51  ;;  %204 = vmatprep.subr.mxu0 %v21_v52  ;;  %v136_v15 = vld [vmem:[%s807_s1 + $0x3c0] sm:$0xff]  ;;  %v135_v17 = vld [vmem:[%s807_s1 + $0x3b8] sm:$0xff]  ;;  %v134_v19 = vld [vmem:[%s807_s1 + $0x3b0] sm:$0xff] }
  0x1d   :  { %275 = vmatprep.subr.mxu1 %v85_v53  ;;  %205 = vmatpush1.msra.mxu0 %v20_v54  ;;  %v69_v20 = vld [vmem:[%s807_s1 + $0x1a8] sm:$0xff]  ;;  %v68_v22 = vld [vmem:[%s807_s1 + $0x1a0] sm:$0xff]  ;;  %v67_v24 = vld [vmem:[%s807_s1 + $0x198] sm:$0xff] }
  0x1e   :  { %276 = vmatpush1.msra.mxu1 %v84_v55  ;;  %206 = vmatprep.subr.mxu0 %v19_v56  ;;  %v133_v21 = vld [vmem:[%s807_s1 + $0x3a8] sm:$0xff]  ;;  %v132_v23 = vld [vmem:[%s807_s1 + $0x3a0] sm:$0xff]  ;;  %v131_v25 = vld [vmem:[%s807_s1 + $0x398] sm:$0xff] }
  0x1f   :  { %277 = vmatprep.subr.mxu1 %v83_v57  ;;  %207 = vmatpush1.msra.mxu0 %v18_v58  ;;  %v66_v26 = vld [vmem:[%s807_s1 + $0x190] sm:$0xff] }
  0x20   :  { %278 = vmatpush1.msra.mxu1 %v82_v59  ;;  %208 = vmatprep.subr.mxu0 %v17_v60  ;;  %v130_v27 = vld [vmem:[%s807_s1 + $0x390] sm:$0xff] }
  0x21   :  { %279 = vmatprep.subr.mxu1 %v81_v61  ;;  %209 = vmatpush1.msra.mxu0 %v16_v62 }
  0x22   :  { %280 = vmatpush1.msra.mxu1 %v80_v63  ;;  %210 = vmatprep.subr.mxu0 %v79_v0 }
  0x23   :  { %281 = vmatprep.subr.mxu1 %v143_v1  ;;  %211 = vmatpush2.msra.mxu0 %v78_v2 }
  0x24   :  { %282 = vmatpush2.msra.mxu1 %v142_v3  ;;  %212 = vmatprep.subr.mxu0 %v77_v4 }
  0x25   :  { %283 = vmatprep.subr.mxu1 %v141_v5  ;;  %213 = vmatpush2.msra.mxu0 %v76_v6 }
  0x26   :  { %284 = vmatpush2.msra.mxu1 %v140_v7  ;;  %214 = vmatprep.subr.mxu0 %v75_v8 }
  0x27   :  { %285 = vmatprep.subr.mxu1 %v139_v9  ;;  %215 = vmatpush2.msra.mxu0 %v74_v10 }
  0x28   :  { %286 = vmatpush2.msra.mxu1 %v138_v11  ;;  %216 = vmatprep.subr.mxu0 %v73_v12 }
  0x29   :  { %287 = vmatprep.subr.mxu1 %v137_v13  ;;  %217 = vmatpush2.msra.mxu0 %v72_v14 }
  0x2a   :  { %288 = vmatpush2.msra.mxu1 %v136_v15  ;;  %218 = vmatprep.subr.mxu0 %v71_v16 }
  0x2b   :  { %289 = vmatprep.subr.mxu1 %v135_v17  ;;  %219 = vmatpush2.msra.mxu0 %v70_v18 }
  0x2c   :  { %290 = vmatpush2.msra.mxu1 %v134_v19  ;;  %220 = vmatprep.subr.mxu0 %v69_v20 }
  0x2d   :  { %291 = vmatprep.subr.mxu1 %v133_v21 }
  0x2e   :  { %8 = vsyncpa [#allocation3], 0  ;;  %221 = vmatpush2.msra.mxu0 %v68_v22  ;;  %292 = vmatpush2.msra.mxu1 %v132_v23  ;;  %v65_v28 = vld [vmem:[%s807_s1 + $0x188] sm:$0xff]  ;;  %v146_v30 = vlaneseq  ;;  %v386_v31 = vmov 1983009808   ;;  %v64_v33 = vld [vmem:[%s807_s1 + $0x180] sm:$0xff] }
  0x2f   :  { %v129_v29 = vld [vmem:[%s807_s1 + $0x388] sm:$0xff]  ;;  %v159_v32 = vunpack.c.l.s4 %v386_v31  ;;  %222 = vmatprep.subr.mxu0 %v67_v24  ;;  %293 = vmatprep.subr.mxu1 %v131_v25  ;;  %v128_v34 = vld [vmem:[%s807_s1 + $0x380] sm:$0xff]  ;;  %v63_v35 = vld [vmem:[%s807_s1 + $0x178] sm:$0xff]  ;;  %vm322_vm0 = vcmask 1041408  }
  0x30   :  { %223 = vmatpush2.msra.mxu0 %v66_v26  ;;  %294 = vmatpush2.msra.mxu1 %v130_v27  ;;  %v127_v36 = vld [vmem:[%s807_s1 + $0x378] sm:$0xff]  ;;  %v62_v37 = vld [vmem:[%s807_s1 + $0x170] sm:$0xff]  ;;  %v61_v39 = vld [vmem:[%s807_s1 + $0x168] sm:$0xff]  ;;  %v714_v41 = vshrl.u32 %v146_v30, 7 }
  0x31   :  { %224 = vmatprep.subr.mxu0 %v65_v28  ;;  %295 = vmatprep.subr.mxu1 %v129_v29  ;;  %v126_v38 = vld [vmem:[%s807_s1 + $0x370] sm:$0xff]  ;;  %v125_v40 = vld [vmem:[%s807_s1 + $0x368] sm:$0xff]  ;;  %v160_v42 = vunpack.c.0.s8 %v159_v32  ;;  %v60_v43 = vld [vmem:[%s807_s1 + $0x160] sm:$0xff] }
  0x32   :  { %225 = vmatpush2.msra.mxu0 %v64_v33  ;;  %296 = vmatpush2.msra.mxu1 %v128_v34  ;;  %v124_v44 = vld [vmem:[%s807_s1 + $0x360] sm:$0xff]  ;;  %v59_v45 = vld [vmem:[%s807_s1 + $0x158] sm:$0xff]  ;;  %v58_v48 = vld [vmem:[%s807_s1 + $0x150] sm:$0xff]  ;;  %v148_v12 = vsub.s32 0, %v714_v41  ;;  %v152_v14 = vsub.s32 1, %v714_v41 }
  0x33   :  { %226 = vmatprep.subr.mxu0 %v63_v35  ;;  %297 = vmatprep.subr.mxu1 %v127_v36  ;;  %v123_v46 = vld [vmem:[%s807_s1 + $0x358] sm:$0xff]  ;;  %v15_v47 = vld [vmem:[%s806_s0] sm:$0xff]  ;;  %v122_v49 = vld [vmem:[%s807_s1 + $0x350] sm:$0xff]  ;;  %v163_v52 = vsub.s32 %v160_v42, %v714_v41 }
  0x34   :  { %227 = vmatpush2.msra.mxu0 %v62_v37  ;;  %298 = vmatpush2.msra.mxu1 %v126_v38  ;;  %v57_v50 = vld [vmem:[%s807_s1 + $0x148] sm:$0xff]  ;;  %v56_v53 = vld [vmem:[%s807_s1 + $0x140] sm:$0xff]  ;;  %v157_v55 = vcombine.high %v15_v47, %v15_v47  ;;  %v55_v56 = vld [vmem:[%s807_s1 + $0x138] sm:$0xff] }
  0x35   :  { %228 = vmatprep.subr.mxu0 %v61_v39  ;;  %299 = vmatprep.subr.mxu1 %v125_v40  ;;  %v121_v51 = vld [vmem:[%s807_s1 + $0x348] sm:$0xff]  ;;  %v120_v54 = vld [vmem:[%s807_s1 + $0x340] sm:$0xff]  ;;  %v119_v57 = vld [vmem:[%s807_s1 + $0x338] sm:$0xff]  ;;  %v164_v62 = vrot.slane %v15_v47, %v163_v52 }
  0x36   :  { %229 = vmatpush2.msra.mxu0 %v60_v43  ;;  %300 = vmatpush2.msra.mxu1 %v124_v44  ;;  %v54_v58 = vld [vmem:[%s807_s1 + $0x130] sm:$0xff]  ;;  %v53_v60 = vld [vmem:[%s807_s1 + $0x128] sm:$0xff]  ;;  %v52_v63 = vld [vmem:[%s807_s1 + $0x120] sm:$0xff]  ;;  %v171_v1 = vrot.slane %v157_v55, %v163_v52 }
  0x37   :  { %230 = vmatprep.subr.mxu0 %v59_v45  ;;  %301 = vmatprep.subr.mxu1 %v123_v46  ;;  %v118_v59 = vld [vmem:[%s807_s1 + $0x330] sm:$0xff]  ;;  %v117_v61 = vld [vmem:[%s807_s1 + $0x328] sm:$0xff]  ;;  %v116_v0 = vld [vmem:[%s807_s1 + $0x320] sm:$0xff]  ;;  %v172_v8 = vcombine.high %v164_v62, %v164_v62 }
  0x38   :  { %231 = vmatpush2.msra.mxu0 %v58_v48  ;;  %302 = vmatpush2.msra.mxu1 %v122_v49  ;;  %v51_v2 = vld [vmem:[%s807_s1 + $0x118] sm:$0xff]  ;;  %v50_v4 = vld [vmem:[%s807_s1 + $0x110] sm:$0xff]  ;;  %v49_v6 = vld [vmem:[%s807_s1 + $0x108] sm:$0xff]  ;;  %v173_v10 = vcombine.high %v171_v1, %v171_v1 }
  0x39   :  { %232 = vmatprep.subr.mxu0 %v57_v50  ;;  %303 = vmatprep.subr.mxu1 %v121_v51  ;;  %v115_v3 = vld [vmem:[%s807_s1 + $0x318] sm:$0xff]  ;;  %v114_v5 = vld [vmem:[%s807_s1 + $0x310] sm:$0xff]  ;;  %v113_v7 = vld [vmem:[%s807_s1 + $0x308] sm:$0xff] }
  0x3a   :  { %233 = vmatpush2.msra.mxu0 %v56_v53  ;;  %304 = vmatpush2.msra.mxu1 %v120_v54  ;;  %v48_v9 = vld [vmem:[%s807_s1 + $0x100] sm:$0xff] }
  0x3b   :  { %234 = vmatprep.subr.mxu0 %v55_v56  ;;  %305 = vmatprep.subr.mxu1 %v119_v57  ;;  %v112_v11 = vld [vmem:[%s807_s1 + $0x300] sm:$0xff]  ;;  %s387_s1 = smov [#allocation2]  }
  0x3c   :  { %235 = vmatpush2.msra.mxu0 %v54_v58  ;;  %306 = vmatpush2.msra.mxu1 %v118_v59  ;;  %v144_v13 = vld [vmem:[%s808_s2] sm:$0x3]  ;;  %s350_s2 = sshll.u32 %s387_s1, 4  ;;  %s351_s2 = int_to_ptr.vmem [resolvable:$true] %s350_s2 }
  0x3d   :  { %236 = vmatprep.subr.mxu0 %v53_v60  ;;  %307 = vmatprep.subr.mxu1 %v117_v61  ;;  %v149_v15 = vrot.slane %v144_v13, %v148_v12  ;;  %v153_v16 = vrot.slane %v144_v13, %v152_v14  ;;  %s364_s27 = scalar_lea.vmem %s351_s2, 64  ;;  %p369_p1 = scmp.lt.s32.totalorder %s351_s2, %s351_s2 }
  0x3e   :  { %237 = vmatpush2.msra.mxu0 %v52_v63  ;;  %308 = vmatpush2.msra.mxu1 %v116_v0  ;;  %p365_p0 = scmp.ne.s32.totalorder %s351_s2, %s364_s27  ;;  %p370_p2 = scmp.lt.s32.totalorder %s364_s27, %s364_s27 }
  0x3f   :  { %238 = vmatprep.subr.mxu0 %v51_v2  ;;  %309 = vmatprep.subr.mxu1 %v115_v3 }
  0x40   :  { %239 = vmatpush2.msra.mxu0 %v50_v4  ;;  %310 = vmatpush2.msra.mxu1 %v114_v5  ;;  %p371_p3 = por %p370_p2, %p369_p1 }
  0x41   :  { %240 = vmatprep.subr.mxu0 %v49_v6  ;;  %311 = vmatprep.subr.mxu1 %v113_v7 }
  0x42   :  { %241 = vmatpush2.msra.mxu0 %v48_v9  ;;  %242 = vmatprep.mubr.f32.mxu0 %v172_v8  ;;  %p372_p4 = pnand %p371_p3, %p365_p0 }
  0x43   :  { %312 = vmatpush2.msra.mxu1 %v112_v11  ;;  %313 = vmatprep.mubr.f32.mxu1 %v173_v10 }
  0x44   :  { %243 = vmatmul.mubr.f32.vlgmr.msra.gmra.mxu0 %v164_v62  ;;  %314 = vmatmul.mubr.f32.vlgmr.msra.gmra.mxu1 %v171_v1 }
 0x104   :  { %v244_v17 = vpop.f32.mrf.mxu0  ;;  %v315_v18 = vpop.f32.mrf.mxu1 }
 0x105   :  { %v245_v19 = vadd.f32 %v244_v17, %v149_v15 }
 0x106   :  { %v246_v20 = vpop.f32.mrf.mxu0  ;;  %v317_v23 = vpop.f32.mrf.mxu1 }
 0x107   :  { %v316_v21 = vadd.f32 %v315_v18, %v245_v19  ;;  %v247_v22 = vadd.f32 %v246_v20, %v153_v16 }
 0x109   :  { %v320_v24 = vmul.f32 %v316_v21, %v316_v21  ;;  %v318_v25 = vadd.f32 %v317_v23, %v247_v22 }
 0x10b   :  { %v321_v26 = vmul.f32 %v318_v25, %v318_v25  ;;  %v323_v27 = vsel %vm322_vm0, %v320_v24, 0.0 }
 0x10d   :  { %v324_v28 = vsel %vm322_vm0, %v321_v26, 0.0 }
 0x10e   :  { %v325_v29 = vadd.f32 %v324_v28, %v323_v27 }
 0x110   :  { %326 = vadd.xlane.f32.xlu0 %v325_v29 }
 0x199   :  { %v327_v30 = vpop.xlane.xlu0 %326 }
 0x19a   :  { %v328_v31 = vmax.f32 %v327_v30, 1e-24 }
 0x19c   :  { %362 = vrsqrt.f32 %v328_v31 }
 0x1a9   :  { %v363_v32 = vpop.eup %362 }
 0x1aa   :  { %v330_v33 = vmul.f32 %v363_v32, %v316_v21  ;;  %v331_v34 = vmul.f32 %v363_v32, %v318_v25 }
 0x1ac   :  { %v334_v35 = vcombine.low %v330_v33, %v331_v34 }
 0x1ae   :  { %358 = vst.sshfl [vmem:[#allocation2] sm:$0x33 pattern:$0x76325410] %v334_v35 }
 0x1af   :  { %375 = shalt.err (!%p372_p4)
}
 0x1b0   :  { %353 = dma.vmem_to_hbm [thread:$0]  %s351_s2, 64, %s809_s3, [#allocation3]  }
 0x1b1   :  { %384 = dma.done.wait [#allocation3], 64  }
 0x1b2   :  { %385 = vsyncadd [#allocation3], 4294967232 }
 0x1b3   :  { %357 = vsyncpa [#allocation3], 1 }

</bundles_post_ra>
